<compile_context>
chip_gen: v6e
topology: v6e:2x2x1
jax: 0.10.0
libtpu: 0.0.40
codegen_flags: <defaults>
</compile_context>

<pallas_src>
import functools
import math

import numpy as np
import jax
import jax.numpy as jnp
from jax.experimental import pallas as pl
from jax.experimental.pallas import tpu as pltpu


# ----------------------------------------------------------------------------
# helpers
# ----------------------------------------------------------------------------
_LANES = 128
_MAX_TILE_ROWS = 4096   # 4096 x 128 x 4B = 2 MiB per f32 input block


def _cdiv(a, b):
    return -(-a // b)


def _round_up(a, b):
    return _cdiv(a, b) * b


def _static_pow(x, e):
    """Static-exponent power that avoids pow(0,0)=NaN pitfalls on TPU."""
    e = float(e)
    if e == 0.0:
        return jnp.ones_like(x)
    if e.is_integer():
        return x ** int(e)
    return jnp.power(x, e)


def _row_tiling(rows):
    """(tile_rows, num_row_blocks) for a lane-dense (rows, 128) layout."""
    if rows <= _MAX_TILE_ROWS:
        return rows, 1
    return _MAX_TILE_ROWS, _cdiv(rows, _MAX_TILE_ROWS)


# ----------------------------------------------------------------------------
# Pallas kernels
# ----------------------------------------------------------------------------
def _center_loss_kernel(p_ref, g_ref, out_ref, acc_ref, *, alpha, beta, eps,
                        total_rows, blocks_total, bps, need_mask):
    """CornerNet-style center loss, gridded reduction.

    Grid = (n_split, bps): leading "parallel" axis splits the row-blocks
    across TensorCores (v7x), inner "arbitrary" axis is the streaming
    reduction.  Each split owns row-blocks [c*bps, (c+1)*bps); indices past
    the real data are clamped in the index_map and fully masked here.

    p_ref/g_ref : (tile_r, 128) f32 blocks of the flattened heatmaps.
    out_ref     : (1, 1, 128) f32 VMEM block; lane 0 = loss_sum, lane 1 = n_pos
    acc_ref     : (2,) f32 SMEM scratch [loss_sum, num_pos] (per-core).
    """
    c = pl.program_id(0)
    i = pl.program_id(1)

    @pl.when(i == 0)
    def _():
        acc_ref[0] = 0.0
        acc_ref[1] = 0.0

    def accumulate(p, g):
        # Exact float equality, faithful to the PyTorch reference (gt must be
        # built in f32; would break if the heatmap round-trips through bf16).
        pos = g == 1.0
        neg = g < 1.0
        # One EUP log per element: log(p+eps) for positives, log(1-p+eps) else.
        lp = jnp.log(jnp.where(pos, p, 1.0 - p) + eps)
        w_pos = _static_pow(1.0 - p, alpha) if float(alpha) != 0.0 else 1.0
        w_neg = _static_pow(1.0 - g, beta) if float(beta) != 0.0 else 1.0
        if float(alpha) != 0.0:
            w_neg = w_neg * _static_pow(p, alpha)
        w = jnp.where(pos, w_pos, jnp.where(neg, w_neg, 0.0))
        # NOTE: sequential f32 cross-block accumulation; fine at rtol=1e-3,
        # revisit for multi-megapixel heatmaps if tighter accuracy is needed.
        acc_ref[0] += jnp.sum(lp * w)
        acc_ref[1] += jnp.sum(jnp.where(pos, 1.0, 0.0))

    blk = c * bps + i
    if need_mask:
        @pl.when(blk < blocks_total - 1)
        def _():
            accumulate(p_ref[...], g_ref[...])

        @pl.when(blk >= blocks_total - 1)
        def _():
            p = p_ref[...]
            g = g_ref[...]
            tr = p.shape[0]
            row = blk * tr + jax.lax.broadcasted_iota(jnp.int32, (tr, 1), 0)
            ok = row < total_rows
            # Clamp to benign values (p=0.5 keeps the log finite, g=2.0 is
            # neither pos nor neg) instead of relying on select-of-NaN.
            accumulate(jnp.where(ok, p, 0.5), jnp.where(ok, g, 2.0))
    else:
        accumulate(p_ref[...], g_ref[...])

    @pl.when(i == pl.num_programs(1) - 1)
    def _():
        lane = jax.lax.broadcasted_iota(jnp.int32, out_ref.shape,
                                        len(out_ref.shape) - 1)
        out_ref[...] = jnp.where(lane == 0, acc_ref[0], acc_ref[1])


def _shape_loss_kernel(p_ref, t_ref, out_ref, acc_ref):
    """Binary (C=2) log-softmax NLL over lane-dense mask probabilities.

    Matches FocalLoss(gamma=0) applied to logits [1-p, p]:
        -logpt = logsumexp(1-p, p) - chosen_logit
    Padding (p=0.5, t=0) contributes exactly ln(2) per element and is
    subtracted analytically in the wrapper, so no in-kernel masking.

    p_ref : (tile_r, 128) f32 blocks   t_ref : (tile_r, 128) uint8 blocks
    out/acc : (1,) f32 SMEM (loss sum)
    """
    step = pl.program_id(0)

    @pl.when(step == 0)
    def _():
        acc_ref[0] = 0.0

    p = p_ref[...]
    t = t_ref[...]
    a = 1.0 - p                         # "logit" of class 0
    b = p                               # "logit" of class 1
    m = jnp.maximum(a, b)
    lse = m + jnp.log(1.0 + jnp.exp(-jnp.abs(a - b)))   # logsumexp(a, b)
    chosen = jnp.where(t == 1, b, a)
    acc_ref[0] += jnp.sum(lse - chosen)

    @pl.when(step == pl.num_programs(0) - 1)
    def _():
        out_ref[0] = acc_ref[0]


def _size_class_kernel(x_ref, t_ref, ts_ref, ps_ref, out_ref, *, gamma,
                       ignore_label, use_ignore, eps):
    """Fused classification focal loss + size L1 loss over the N centers.

    x_ref : (N, C) f32 semantic logits     t_ref : (N, 1) i32 class targets
    ts_ref/ps_ref : (N, 2) f32 true / predicted sizes
    out_ref : (3,) f32 SMEM [class_loss_sum, class_keep_count, size_l1_sum]
    """
    # TODO(synk): for production-sized N (thousands of centers) grid over N
    # row tiles with an SMEM accumulator; kept fused here since N is tiny.
    x = x_ref[...]
    t = t_ref[...]
    n, c = x.shape
    col = jax.lax.broadcasted_iota(jnp.int32, (n, c), 1)
    sel = col == t

    m = jnp.max(x, axis=-1, keepdims=True)
    sh = x - m
    lse = jnp.log(jnp.sum(jnp.exp(sh), axis=-1, keepdims=True))
    logp = sh - lse
    logpt = jnp.sum(jnp.where(sel, logp, 0.0), axis=-1, keepdims=True)  # (N,1)

    if float(gamma) == 0.0:
        loss = -logpt                                   # skip the exp entirely
    else:
        pt = jnp.exp(logpt)
        loss = -_static_pow(1.0 - pt, gamma) * logpt

    if use_ignore:
        keep = jnp.where(t != ignore_label, 1.0, 0.0)
    else:
        keep = jnp.ones_like(loss)

    out_ref[0] = jnp.sum(loss * keep)
    out_ref[1] = jnp.sum(keep)

    ts = ts_ref[...]
    ps = ps_ref[...]
    out_ref[2] = jnp.sum(jnp.abs(ts - ps) / (ts + eps))


# ----------------------------------------------------------------------------
# Pallas wrappers
# ----------------------------------------------------------------------------
def center_loss_pallas(preds, gt, alpha, beta, eps):
    preds = jnp.asarray(preds, jnp.float32).reshape(-1)
    gt = jnp.asarray(gt, jnp.float32).reshape(-1)
    n = int(preds.shape[0])

    # Lane-dense layout; if n is not a multiple of 128 pad with neutral
    # values (p=0.5 keeps log finite, g=2.0 is neither pos nor neg) instead
    # of falling back to narrow W-column blocks.
    rows = _cdiv(n, _LANES)
    pad = rows * _LANES - n
    if pad:
        preds = jnp.pad(preds, (0, pad), constant_values=0.5)
        gt = jnp.pad(gt, (0, pad), constant_values=2.0)
    p2 = preds.reshape(rows, _LANES)
    g2 = gt.reshape(rows, _LANES)

    tile_r, blocks_total = _row_tiling(rows)
    n_split = 2 if blocks_total >= 2 else 1     # v7x: one half per TensorCore
    bps = _cdiv(blocks_total, n_split)          # blocks per split
    need_mask = rows != tile_r * bps * n_split  # ragged last block / overflow

    def in_map(c, i):
        return (jnp.minimum(c * bps + i, blocks_total - 1), 0)

    cost = pl.CostEstimate(flops=14 * rows * _LANES,
                           transcendentals=rows * _LANES,
                           bytes_accessed=2 * 4 * rows * _LANES)

    out = pl.pallas_call(
        functools.partial(_center_loss_kernel, alpha=alpha, beta=beta,
                          eps=eps, total_rows=rows,
                          blocks_total=blocks_total, bps=bps,
                          need_mask=need_mask),
        out_shape=jax.ShapeDtypeStruct((n_split, 1, _LANES), jnp.float32),
        grid=(n_split, bps),
        in_specs=[pl.BlockSpec((tile_r, _LANES), in_map),
                  pl.BlockSpec((tile_r, _LANES), in_map)],
        out_specs=pl.BlockSpec((1, 1, _LANES), lambda c, i: (c, 0, 0)),
        scratch_shapes=[pltpu.SMEM((2,), jnp.float32)],
        compiler_params=pltpu.CompilerParams(
            dimension_semantics=("parallel", "arbitrary")),
        cost_estimate=cost,
    )(p2, g2)

    loss_sum = jnp.sum(out[:, 0, 0])
    num_pos = jnp.sum(out[:, 0, 1])
    # pos_loss == 0 whenever num_pos == 0, so this reproduces both branches
    # of the reference: -(pos+neg)/num_pos  and  -neg_loss.
    return -loss_sum / jnp.maximum(num_pos, 1.0)


def shape_loss_pallas(p_flat, t_flat):
    # p_flat: (M,) f32 mask probabilities, t_flat: (M,) {0,1} targets.
    m = int(p_flat.shape[0])
    rows0 = _cdiv(m, _LANES)
    if rows0 <= _MAX_TILE_ROWS:
        tile_r, grid_r = _round_up(rows0, 32), 1
    else:
        tile_r, grid_r = _MAX_TILE_ROWS, _cdiv(rows0, _MAX_TILE_ROWS)
    rows = tile_r * grid_r
    pad = rows * _LANES - m

    # Host-side tail pad only — this data is already host-built by the glue.
    # Pad contribution is exactly ln(2) per element (p=0.5, t=0), removed
    # analytically below, so the kernel needs no per-element masking.
    p = np.pad(np.asarray(p_flat, np.float32), (0, pad), constant_values=0.5)
    t = np.pad(np.asarray(t_flat, np.float32).astype(np.uint8), (0, pad),
               constant_values=0)
    p2 = jnp.asarray(p.reshape(rows, _LANES))
    t2 = jnp.asarray(t.reshape(rows, _LANES))

    total = rows * _LANES
    cost = pl.CostEstimate(flops=8 * total, transcendentals=2 * total,
                           bytes_accessed=5 * total)

    out = pl.pallas_call(
        _shape_loss_kernel,
        out_shape=jax.ShapeDtypeStruct((1,), jnp.float32),
        grid=(grid_r,),
        in_specs=[pl.BlockSpec((tile_r, _LANES), lambda i: (i, 0)),
                  pl.BlockSpec((tile_r, _LANES), lambda i: (i, 0))],
        out_specs=pl.BlockSpec(memory_space=pltpu.MemorySpace.SMEM),
        scratch_shapes=[pltpu.SMEM((1,), jnp.float32)],
        compiler_params=pltpu.CompilerParams(
            dimension_semantics=("arbitrary",)),
        cost_estimate=cost,
    )(p2, t2)
    return (out[0] - float(pad) * math.log(2.0)) / float(m)


def size_class_loss_pallas(sem_logits, tcls, true_size, pred_size, gamma,
                           ignore_label, eps):
    # sem_logits: (N, C), tcls: (N,), true_size/pred_size: (N, 2). N is small.
    n, c = int(sem_logits.shape[0]), int(sem_logits.shape[1])
    x = jnp.asarray(sem_logits, jnp.float32)
    t = jnp.asarray(tcls, jnp.int32).reshape(n, 1)
    ts = jnp.asarray(true_size, jnp.float32)
    ps = jnp.asarray(pred_size, jnp.float32)
    use_ignore = ignore_label is not None
    ig = int(ignore_label) if use_ignore else 0

    cost = pl.CostEstimate(flops=8 * n * c + 10 * n, transcendentals=n * c,
                           bytes_accessed=4 * (n * c + n + 4 * n) + 12)

    out = pl.pallas_call(
        functools.partial(_size_class_kernel, gamma=gamma, ignore_label=ig,
                          use_ignore=use_ignore, eps=eps),
        out_shape=jax.ShapeDtypeStruct((3,), jnp.float32),
        in_specs=[pl.BlockSpec(memory_space=pltpu.MemorySpace.VMEM)] * 4,
        out_specs=pl.BlockSpec(memory_space=pltpu.MemorySpace.SMEM),
        cost_estimate=cost,
    )(x, t, ts, ps)

    loss_class = out[0] / jnp.maximum(out[1], 1.0)
    loss_size = out[2] / float(n)
    return loss_size, loss_class


# ----------------------------------------------------------------------------
# host-side glue mirroring PaPsLoss.forward
# ----------------------------------------------------------------------------
def _build_shape_pairs(center_mask, true_instances, zones, center_mapping,
                       instance_boxes, instance_masks):
    # TODO(synk): data-dependent loops (unique/nonzero/dict lookup/variable
    # crops) have no static Pallas equivalent; kept as host-side glue.
    flatten_preds, flatten_targets = [], []
    for b in range(true_instances.shape[0]):
        instance_mask = true_instances[b]
        for inst_id in np.unique(instance_mask):
            centers = center_mask[b] & (zones[b] == inst_id)
            if not centers.any():
                continue
            for x, y in np.argwhere(centers):
                true_mask = (instance_mask == inst_id).astype(np.float32)
                pred_id = center_mapping[(int(b), int(x), int(y))]
                xtl, ytl, xbr, ybr = instance_boxes[pred_id]
                crop_true = true_mask[ytl:ybr, xtl:xbr].reshape(-1)
                mask = np.asarray(instance_masks[pred_id]).reshape(-1)
                flatten_preds.append(mask)
                flatten_targets.append(crop_true)
    if not flatten_targets:
        return None, None
    p = np.concatenate(flatten_preds, axis=0).astype(np.float32)
    t = np.concatenate(flatten_targets, axis=0).astype(np.float32)
    return p, t


def paps_loss(predictions, target, *, l_center=1, l_size=1, l_shape=1,
              l_class=1, alpha=0, beta=4, gamma=0, eps=1e-8,
              ignore_index=-100, binary_threshold=0.4):
    target = np.asarray(target, np.float32)                # (B, 7, H, W)
    target_heatmap = target[:, 0]
    true_instances = target[:, 1]
    zones = target[:, 2]
    size = np.transpose(target[:, 3:5], (0, 2, 3, 1))      # (B, H, W, 2)
    sem_obj = target[:, 5]
    # sem_pix = target[:, 6]  (unused, as in reference)

    center_mask = np.asarray(predictions['center_mask']).astype(bool)
    nz = np.argwhere(center_mask)
    center_mapping = {(int(b), int(i), int(j)): k
                      for k, (b, i, j) in enumerate(nz)}

    loss_center = jnp.float32(0.0)
    loss_size = jnp.float32(0.0)
    loss_shape = jnp.float32(0.0)
    loss_class = jnp.float32(0.0)

    if l_center != 0:
        loss_center = center_loss_pallas(
            jnp.asarray(predictions['heatmap'], jnp.float32),
            jnp.asarray(target_heatmap, jnp.float32),
            alpha, beta, eps)

    pred_size = np.asarray(predictions['size'], np.float32)
    if pred_size.shape[0] != 0:
        if l_size != 0 or l_class != 0:
            true_size = size[center_mask]                  # (N, 2)
            tcls = sem_obj[center_mask].astype(np.int32)   # (N,)
            ls, lc = size_class_loss_pallas(
                np.asarray(predictions['semantic'], np.float32), tcls,
                true_size, pred_size, gamma, ignore_index, eps)
            if l_size != 0:
                loss_size = ls
            if l_class != 0:
                loss_class = lc
        if l_shape != 0:
            p_flat, t_flat = _build_shape_pairs(
                center_mask, true_instances, zones, center_mapping,
                np.asarray(predictions['instance_boxes']).astype(int),
                predictions['instance_masks'])
            if p_flat is not None:
                loss_shape = shape_loss_pallas(p_flat, t_flat)

    return {'loss_center': l_center * loss_center,
            'loss_size': l_size * loss_size,
            'loss_shape': l_shape * loss_shape,
            'loss_class': l_class * loss_class}


# ----------------------------------------------------------------------------
# numpy references (for the self-check)
# ----------------------------------------------------------------------------
def _ref_center(preds, gt, alpha, beta, eps):
    p = preds.reshape(-1).astype(np.float64)
    g = gt.reshape(-1).astype(np.float64)
    pos = g == 1
    neg = g < 1
    num_pos = pos.sum()
    pos_loss = (np.log(p[pos] + eps) * (1 - p[pos]) ** alpha).sum()
    neg_loss = (np.log(1 - p[neg] + eps) * p[neg] ** alpha
                * (1 - g[neg]) ** beta).sum()
    if num_pos == 0:
        return -neg_loss
    return -(pos_loss + neg_loss) / num_pos


def _ref_focal(preds, target, gamma, ignore):
    preds = preds.astype(np.float64)
    target = target.astype(np.int64)
    if ignore is not None:
        keep = target != ignore
        preds = preds[keep]
        target = target[keep]
    x = preds - preds.max(axis=1, keepdims=True)
    logp = x - np.log(np.exp(x).sum(axis=1, keepdims=True))
    logpt = logp[np.arange(len(target)), target]
    pt = np.exp(logpt)
    return (-(1 - pt) ** gamma * logpt).mean()


# ----------------------------------------------------------------------------
# main
# ----------------------------------------------------------------------------
if __name__ == "__main__":
    key = jax.random.PRNGKey(0)
    B, H, W, NCLS = 2, 16, 16, 5
    EPS = 1e-8

    # ---- ground-truth target tensor (B, 7, H, W) ----
    qi = (np.arange(H) >= H // 2).astype(np.float32)
    qj = (np.arange(W) >= W // 2).astype(np.float32)
    inst = qi[:, None] * 2 + qj[None, :]                   # quadrant ids 0..3
    true_instances = np.stack([inst, inst], axis=0).astype(np.float32)
    zones = true_instances.copy()

    center_mask = np.zeros((B, H, W), bool)
    for b in range(B):
        for r in (4, 12):
            for c in (4, 12):
                center_mask[b, r, c] = True
    N = int(center_mask.sum())                             # 8 centers

    key, k1, k2, k3, k4, k5, k6 = jax.random.split(key, 7)
    th = np.array(jax.random.uniform(k1, (B, H, W)), np.float32) * 0.9
    th[center_mask] = 1.0
    size_t = np.array(jax.random.uniform(k2, (B, 2, H, W),
                                         minval=1.0, maxval=10.0), np.float32)
    sem_obj = ((true_instances + np.arange(B).reshape(B, 1, 1)) % NCLS
               ).astype(np.float32)
    sem_pix = np.zeros((B, H, W), np.float32)
    target = np.concatenate([th[:, None], true_instances[:, None],
                             zones[:, None], size_t, sem_obj[:, None],
                             sem_pix[:, None]], axis=1).astype(np.float32)

    # ---- predictions ----
    heat_pred = np.array(jax.nn.sigmoid(jax.random.normal(k3, (B, H, W))),
                         np.float32)
    size_pred = np.array(jax.random.uniform(k4, (N, 2), minval=1.0,
                                            maxval=10.0), np.float32)
    sem_pred = np.array(jax.random.normal(k5, (N, NCLS)), np.float32)
    inst_masks = np.array(jax.nn.sigmoid(jax.random.normal(k6, (N, 8, 8))),
                          np.float32)
    nz = np.argwhere(center_mask)
    boxes = []
    for b, r, c in nz:
        ytl = int(np.clip(r - 3, 0, H - 8))
        xtl = int(np.clip(c - 3, 0, W - 8))
        boxes.append([xtl, ytl, xtl + 8, ytl + 8])
    inst_boxes = np.array(boxes, np.int32)

    predictions = {'center_mask': center_mask,
                   'heatmap': heat_pred,
                   'size': size_pred,
                   'semantic': sem_pred,
                   'instance_boxes': inst_boxes,
                   'instance_masks': inst_masks}

    losses = paps_loss(predictions, target)
    losses = {k: jax.block_until_ready(v) for k, v in losses.items()}

    # ---- reference check ----
    ref_center = _ref_center(heat_pred, th, 0, 4, EPS)
    size_perm = np.transpose(size_t, (0, 2, 3, 1))
    ts = size_perm[center_mask]
    ref_size = (np.abs(ts - size_pred) / (ts + EPS)).sum(-1).mean()
    ref_class = _ref_focal(sem_pred, sem_obj[center_mask].astype(np.int64),
                           0, -100)
    cm = {(int(b), int(i), int(j)): k for k, (b, i, j) in enumerate(nz)}
    p_flat, t_flat = _build_shape_pairs(center_mask, true_instances, zones, cm,
                                        inst_boxes, inst_masks)
    preds2 = np.stack([1.0 - p_flat, p_flat], axis=1)
    ref_shape = _ref_focal(preds2, t_flat.astype(np.int64), 0, None)

    np.testing.assert_allclose(float(losses['loss_center']), ref_center,
                               rtol=1e-3, atol=1e-5)
    np.testing.assert_allclose(float(losses['loss_size']), ref_size,
                               rtol=1e-3, atol=1e-5)
    np.testing.assert_allclose(float(losses['loss_class']), ref_class,
                               rtol=1e-3, atol=1e-5)
    np.testing.assert_allclose(float(losses['loss_shape']), ref_shape,
                               rtol=1e-3, atol=1e-5)

    print("KERNEL_OK")
</pallas_src>

<mosaic_0001>
module attributes {stable_mosaic.version = 11 : i64} {
  func.func @_center_loss_kernel(%arg0: i32, %arg1: i32, %arg2: memref<4x128xf32, #tpu.memory_space<vmem>>, %arg3: memref<4x128xf32, #tpu.memory_space<vmem>>, %arg4: memref<1x1x128xf32, #tpu.memory_space<vmem>>, %arg5: memref<2xf32, #tpu.memory_space<smem>>) attributes {dimension_semantics = [#tpu.dimension_semantics<parallel>, #tpu.dimension_semantics<arbitrary>], iteration_bounds = array<i64: 1, 1>, scalar_prefetch = 0 : i64, scratch_operands = 1 : i64, tpu.core_type = #tpu.core_type<tc>, window_params = [{transform_indices = @transform_0, window_bounds = array<i64: 4, 128>}, {transform_indices = @transform_1, window_bounds = array<i64: 4, 128>}, {transform_indices = @transform_2, window_bounds = array<i64: 1, 1, 128>}]} {
    %c0_i32 = arith.constant 0 : i32
    %0 = arith.cmpi eq, %arg1, %c0_i32 : i32
    %1 = arith.extui %0 : i1 to i32
    %c0_i32_0 = arith.constant 0 : i32
    %2 = arith.cmpi ne, %1, %c0_i32_0 : i32
    scf.if %2 {
      %cst_19 = arith.constant 0.000000e+00 : f32
      %c0_20 = arith.constant 0 : index
      %44 = memref.load %arg5[%c0_20] : memref<2xf32, #tpu.memory_space<smem>>
      memref.store %cst_19, %arg5[%c0_20] : memref<2xf32, #tpu.memory_space<smem>>
      %cst_21 = arith.constant 0.000000e+00 : f32
      %c1_22 = arith.constant 1 : index
      %45 = memref.load %arg5[%c1_22] : memref<2xf32, #tpu.memory_space<smem>>
      memref.store %cst_21, %arg5[%c1_22] : memref<2xf32, #tpu.memory_space<smem>>
    } else {
    }
    %c0 = arith.constant 0 : index
    %c0_1 = arith.constant 0 : index
    %3 = vector.load %arg2[%c0, %c0_1] : memref<4x128xf32, #tpu.memory_space<vmem>>, vector<4x128xf32>
    %c0_2 = arith.constant 0 : index
    %c0_3 = arith.constant 0 : index
    %4 = vector.load %arg3[%c0_2, %c0_3] : memref<4x128xf32, #tpu.memory_space<vmem>>, vector<4x128xf32>
    %cst = arith.constant 1.000000e+00 : f32
    %5 = vector.broadcast %cst : f32 to vector<4x128xf32>
    %6 = arith.cmpf oeq, %4, %5 : vector<4x128xf32>
    %cst_4 = arith.constant 1.000000e+00 : f32
    %7 = vector.broadcast %cst_4 : f32 to vector<4x128xf32>
    %8 = arith.cmpf olt, %4, %7 : vector<4x128xf32>
    %cst_5 = arith.constant 1.000000e+00 : f32
    %9 = vector.broadcast %cst_5 : f32 to vector<4x128xf32>
    %10 = arith.subf %9, %3 : vector<4x128xf32>
    %11 = arith.select %6, %3, %10 : vector<4x128xi1>, vector<4x128xf32>
    %cst_6 = arith.constant 9.99999993E-9 : f32
    %12 = vector.broadcast %cst_6 : f32 to vector<4x128xf32>
    %13 = arith.addf %11, %12 : vector<4x128xf32>
    %14 = math.log %13 : vector<4x128xf32>
    %cst_7 = arith.constant 1.000000e+00 : f32
    %15 = vector.broadcast %cst_7 : f32 to vector<4x128xf32>
    %16 = arith.subf %15, %4 : vector<4x128xf32>
    %17 = arith.mulf %16, %16 : vector<4x128xf32>
    %18 = arith.mulf %17, %17 : vector<4x128xf32>
    %cst_8 = arith.constant 0.000000e+00 : f32
    %19 = vector.broadcast %cst_8 : f32 to vector<4x128xf32>
    %20 = arith.select %8, %18, %19 : vector<4x128xi1>, vector<4x128xf32>
    %cst_9 = arith.constant 1.000000e+00 : f32
    %21 = vector.broadcast %cst_9 : f32 to vector<4x128xf32>
    %22 = arith.select %6, %21, %20 : vector<4x128xi1>, vector<4x128xf32>
    %c0_10 = arith.constant 0 : index
    %23 = memref.load %arg5[%c0_10] : memref<2xf32, #tpu.memory_space<smem>>
    %24 = arith.mulf %14, %22 : vector<4x128xf32>
    %25 = vector.shape_cast %24 : vector<4x128xf32> to vector<1x4x128xf32>
    %cst_11 = arith.constant dense<0.000000e+00> : vector<1xf32>
    %26 = vector.multi_reduction <add>, %25, %cst_11 [1, 2] : vector<1x4x128xf32> to vector<1xf32>
    %27 = vector.shape_cast %26 : vector<1xf32> to vector<1x1x1xf32>
    %28 = vector.extract %27[0, 0, 0] : f32 from vector<1x1x1xf32>
    %29 = arith.addf %23, %28 : f32
    %c0_12 = arith.constant 0 : index
    %30 = memref.load %arg5[%c0_12] : memref<2xf32, #tpu.memory_space<smem>>
    memref.store %29, %arg5[%c0_12] : memref<2xf32, #tpu.memory_space<smem>>
    %c1 = arith.constant 1 : index
    %31 = memref.load %arg5[%c1] : memref<2xf32, #tpu.memory_space<smem>>
    %cst_13 = arith.constant 1.000000e+00 : f32
    %cst_14 = arith.constant 0.000000e+00 : f32
    %32 = vector.broadcast %cst_13 : f32 to vector<4x128xf32>
    %33 = vector.broadcast %cst_14 : f32 to vector<4x128xf32>
    %34 = arith.select %6, %32, %33 : vector<4x128xi1>, vector<4x128xf32>
    %35 = vector.shape_cast %34 : vector<4x128xf32> to vector<1x4x128xf32>
    %cst_15 = arith.constant dense<0.000000e+00> : vector<1xf32>
    %36 = vector.multi_reduction <add>, %35, %cst_15 [1, 2] : vector<1x4x128xf32> to vector<1xf32>
    %37 = vector.shape_cast %36 : vector<1xf32> to vector<1x1x1xf32>
    %38 = vector.extract %37[0, 0, 0] : f32 from vector<1x1x1xf32>
    %39 = arith.addf %31, %38 : f32
    %c1_16 = arith.constant 1 : index
    %40 = memref.load %arg5[%c1_16] : memref<2xf32, #tpu.memory_space<smem>>
    memref.store %39, %arg5[%c1_16] : memref<2xf32, #tpu.memory_space<smem>>
    %c0_i32_17 = arith.constant 0 : i32
    %41 = arith.cmpi eq, %arg1, %c0_i32_17 : i32
    %42 = arith.extui %41 : i1 to i32
    %c0_i32_18 = arith.constant 0 : i32
    %43 = arith.cmpi ne, %42, %c0_i32_18 : i32
    scf.if %43 {
      %44 = tpu.iota {dimensions = array<i32: 2>} : vector<1x1x128xi32>
      %c0_i32_19 = arith.constant 0 : i32
      %45 = vector.broadcast %c0_i32_19 : i32 to vector<1x1x128xi32>
      %46 = arith.cmpi eq, %44, %45 : vector<1x1x128xi32>
      %c0_20 = arith.constant 0 : index
      %47 = memref.load %arg5[%c0_20] : memref<2xf32, #tpu.memory_space<smem>>
      %c1_21 = arith.constant 1 : index
      %48 = memref.load %arg5[%c1_21] : memref<2xf32, #tpu.memory_space<smem>>
      %49 = vector.broadcast %47 : f32 to vector<1x1x128xf32>
      %50 = vector.broadcast %48 : f32 to vector<1x1x128xf32>
      %51 = arith.select %46, %49, %50 : vector<1x1x128xi1>, vector<1x1x128xf32>
      %c0_22 = arith.constant 0 : index
      %c0_23 = arith.constant 0 : index
      %c0_24 = arith.constant 0 : index
      %52 = vector.load %arg4[%c0_22, %c0_23, %c0_24] : memref<1x1x128xf32, #tpu.memory_space<vmem>>, vector<1x1x128xf32>
      tpu.vector_store %arg4[%c0_22, %c0_23, %c0_24], %51 {strides = array<i32>} : memref<1x1x128xf32, #tpu.memory_space<vmem>>, vector<1x1x128xf32>,
    } else {
    }
    return
  }
  func.func @transform_0(%arg0: i32, %arg1: i32) -> (i32, i32) {
    %c1_i32 = arith.constant 1 : i32
    %0 = arith.muli %arg0, %c1_i32 : i32
    %1 = arith.addi %0, %arg1 : i32
    %c0_i32 = arith.constant 0 : i32
    %2 = arith.minsi %1, %c0_i32 : i32
    %c0_i32_0 = arith.constant 0 : i32
    %c0_i32_1 = arith.constant 0 : i32
    return %2, %c0_i32_0 : i32, i32
  }
  func.func @transform_1(%arg0: i32, %arg1: i32) -> (i32, i32) {
    %c1_i32 = arith.constant 1 : i32
    %0 = arith.muli %arg0, %c1_i32 : i32
    %1 = arith.addi %0, %arg1 : i32
    %c0_i32 = arith.constant 0 : i32
    %2 = arith.minsi %1, %c0_i32 : i32
    %c0_i32_0 = arith.constant 0 : i32
    %c0_i32_1 = arith.constant 0 : i32
    return %2, %c0_i32_0 : i32, i32
  }
  func.func @transform_2(%arg0: i32, %arg1: i32) -> (i32, i32, i32) {
    %c0_i32 = arith.constant 0 : i32
    %c0_i32_0 = arith.constant 0 : i32
    %c0_i32_1 = arith.constant 0 : i32
    return %arg0, %c0_i32, %c0_i32_0 : i32, i32, i32
  }
}

</mosaic_0001>

<bundles_post_ra>
// kernel: tpu_custom_call.1
= control target key start
LH: loop header
LB: loop body
LE: loop exit
PB: predicated region body
PF: predicated region fallthrough
CT: control target
= control target key end

     0   :  { %7 = vsyncpa [#allocation4], 0  ;;  %s246_s0 = inlined_call_operand.hbm [shape: f32[4,128], index: 0, kind: input, shape index: {}]   ;;  %s247_s1 = inlined_call_operand.hbm [shape: f32[4,128], index: 1, kind: input, shape index: {}]   ;;  %s248_s2 = inlined_call_operand.hbm [shape: f32[1,1,128], index: 2, kind: output, shape index: {}]  }
   0x1   :  { %8 = vsyncpa [#allocation7], 0 }
   0x2   :  { %9 = vsyncpa [#allocation5], 0  ;;  %s215_s9 = smov [#allocation3]   ;;  %s216_s11 = smov [#allocation6]  }
   0x3   :  { %s21_s10 = sshll.u32 %s215_s9, 4  ;;  %s36_s12 = sshll.u32 %s216_s11, 4  ;;  %s22_s10 = int_to_ptr.vmem [resolvable:$true] %s21_s10  ;;  %s37_s12 = int_to_ptr.vmem [resolvable:$true] %s36_s12 }
   0x4   :  { %s157_s13 = scalar_lea.vmem %s22_s10, 64  ;;  %p162_p1 = scmp.lt.s32.totalorder %s22_s10, %s22_s10 }
   0x5   :  { %p158_p0 = scmp.ne.s32.totalorder %s22_s10, %s157_s13  ;;  %p163_p2 = scmp.lt.s32.totalorder %s157_s13, %s157_s13 }
   0x7   :  { %p164_p3 = por %p163_p2, %p162_p1 }
   0x9   :  { %p165_p4 = pnand %p164_p3, %p158_p0 }
   0xb   :  { %168 = shalt.err (!%p165_p4)
}
   0xc   :  { %24 = dma.hbm_to_vmem [thread:$0]  %s246_s0, 64, %s22_s10, [#allocation4]  }
   0xd   :  { %s177_s16 = scalar_lea.vmem %s37_s12, 64  ;;  %p182_p6 = scmp.lt.s32.totalorder %s37_s12, %s37_s12 }
   0xe   :  { %p178_p5 = scmp.ne.s32.totalorder %s37_s12, %s177_s16  ;;  %p183_p7 = scmp.lt.s32.totalorder %s177_s16, %s177_s16 }
  0x10   :  { %p184_p8 = por %p183_p7, %p182_p6 }
  0x12   :  { %p185_p9 = pnand %p184_p8, %p178_p5 }
  0x14   :  { %188 = shalt.err (!%p185_p9)
}
  0x15   :  { %39 = dma.hbm_to_vmem [thread:$0]  %s247_s1, 64, %s37_s12, [#allocation7]  }
  0x16   :  { %209 = dma.done.wait [#allocation4], 64  }
  0x17   :  { %210 = vsyncadd [#allocation4], 4294967232 }
  0x18   :  { %211 = dma.done.wait [#allocation7], 64  }
  0x19   :  { %212 = vsyncadd [#allocation7], 4294967232  ;;  %v60_v0 = vld [vmem:[#allocation3] sm:$0xf]  ;;  %v61_v1 = vld [vmem:[#allocation6] sm:$0xf]  ;;  %v108_v31 = vlaneseq }
  0x1a   :  { %vm62_vm0 = vcmp.eq.f32.partialorder %v61_v1, 1.0  ;;  %v64_v2 = vsub.f32 1.0, %v60_v0  ;;  %v69_v5 = vsub.f32 1.0, %v61_v1  ;;  %vm63_vm1 = vcmp.lt.f32.partialorder %v61_v1, 1.0  ;;  %s218_s1 = smov [#allocation8]  }
  0x1b   :  { %vm76_vm2 = vcmask 1043456   ;;  %v217_v13 = vmov 0.0   ;;  %v109_v32 = vand.u32 127, %v108_v31  ;;  %s123_s19 = sshll.u32 %s218_s1, 4  ;;  %s124_s19 = int_to_ptr.vmem [resolvable:$true] %s123_s19 }
  0x1c   :  { %v65_v3 = vsel %vm62_vm0, %v60_v0, %v64_v2  ;;  %v70_v6 = vmul.f32 %v69_v5, %v69_v5  ;;  %v91_v14 = vsel %vm62_vm0, 1.0, %v217_v13  ;;  %s189_s21 = scalar_lea.vmem %s124_s19, 16  ;;  %s193_s22 = scalar_lea.vmem %s124_s19, 32 }
  0x1d   :  { %v66_v4 = vadd.f32 1e-08, %v65_v3  ;;  %v92_v16 = vsel %vm76_vm2, %v91_v14, 0.0  ;;  %vm110_vm3 = vcmp.eq.s32.totalorder %v109_v32, 0  ;;  %p190_p10 = scmp.ne.s32.totalorder %s124_s19, %s189_s21  ;;  %p194_p11 = scmp.lt.s32.totalorder %s124_s19, %s124_s19 }
  0x1e   :  { %v71_v7 = vmul.f32 %v70_v6, %v70_v6  ;;  %p195_p12 = scmp.lt.s32.totalorder %s193_s22, %s189_s21 }
  0x1f   :  { %147 = vlog2.f32 %v66_v4 }
  0x20   :  { %v72_v8 = vsel %vm63_vm1, %v71_v7, 0.0  ;;  %p196_p13 = por %p195_p12, %p194_p11 }
  0x21   :  { %v73_v10 = vsel %vm62_vm0, 1.0, %v72_v8 }
  0x22   :  { %p197_p0 = pnand %p196_p13, %p190_p10 }
  0x2c   :  { %v148_v9 = vpop.eup %147 }
  0x2d   :  { %v68_v11 = vmul.f32 0.6931472, %v148_v9 }
  0x2f   :  { %v75_v12 = vmul.f32 %v73_v10, %v68_v11 }
  0x31   :  { %v77_v15 = vsel %vm76_vm2, %v75_v12, 0.0 }
  0x32   :  { %78 = vadd.xlane.f32.xlu0 %v77_v15 }
  0x36   :  { %93 = vadd.xlane.f32.xlu0 %v92_v16 }
  0xbb   :  { %v79_v17 = vpop.xlane.xlu0 %78 }
  0xbc   :  { %v80_v18 = vrot.slane %v79_v17, 4 }
  0xbe   :  { %v81_v19 = vadd.f32 %v80_v18, %v79_v17 }
  0xbf   :  { %v94_v20 = vpop.xlane.xlu0 %93 }
  0xc0   :  { %v82_v21 = vrot.slane %v81_v19, 2  ;;  %v95_v22 = vrot.slane %v94_v20, 4 }
  0xc2   :  { %v96_v23 = vadd.f32 %v95_v22, %v94_v20  ;;  %v83_v24 = vadd.f32 %v82_v21, %v81_v19 }
  0xc4   :  { %v97_v25 = vrot.slane %v96_v23, 2  ;;  %v84_v26 = vrot.slane %v83_v24, 1 }
  0xc6   :  { %v98_v27 = vadd.f32 %v97_v25, %v96_v23  ;;  %v85_v28 = vadd.f32 %v84_v26, %v83_v24 }
  0xc8   :  { %139 = vpush %v85_v28  ;;  %v99_v29 = vrot.slane %v98_v27, 1 }
  0xca   :  { %v100_v30 = vadd.f32 %v99_v29, %v98_v27 }
  0xcc   :  { %141 = vpush %v100_v30 }
  0xf9   :  { %s140_s0 = spop %139 }
  0xfa   :  { %v113_v33 = vstv %s140_s0 }
  0xfd   :  { %s142_s20 = spop %141 }
  0xfe   :  { %v114_v34 = vstv %s142_s20 }
  0xff   :  { %v115_v35 = vsel %vm110_vm3, %v113_v33, %v114_v34 }
 0x100   :  { %116 = vst [vmem:[#allocation8] sm:$0x1] %v115_v35 }
 0x101   :  { %200 = shalt.err (!%p197_p0)
}
 0x102   :  { %126 = dma.vmem_to_hbm [thread:$0]  %s124_s19, 16, %s248_s2, [#allocation5]  }
 0x103   :  { %213 = dma.done.wait [#allocation5], 16  }
 0x104   :  { %214 = vsyncadd [#allocation5], 4294967280 }
 0x105   :  { %130 = vsyncpa [#allocation4], 1 }
 0x106   :  { %131 = vsyncpa [#allocation7], 1 }
 0x107   :  { %132 = vsyncpa [#allocation5], 1 }

</bundles_post_ra>
